<compile_context>
chip_gen: v6e
topology: v6e:2x2x1
jax: 0.10.0
libtpu: 0.0.40
codegen_flags: <defaults>
</compile_context>

<pallas_src>
import functools
import math

import jax
import jax.numpy as jnp
import numpy as np
from jax.experimental import pallas as pl
from jax.experimental.pallas import tpu as pltpu


def _layernorm(x, gamma, beta, eps=1e-5):
    # torch.nn.LayerNorm: biased variance, eps inside rsqrt
    mean = jnp.mean(x, axis=-1, keepdims=True)
    var = jnp.mean((x - mean) ** 2, axis=-1, keepdims=True)
    return (x - mean) * jax.lax.rsqrt(var + eps) * gamma + beta


# ----------------------------------------------------------------------------
# Kernel 1: fused Q/K/V projections, row-tiled over B*S.
# ----------------------------------------------------------------------------
def _qkv_kernel(x_ref, wq_ref, wk_ref, wv_ref, q_ref, k_ref, v_ref, *,
                compute_dtype):
    x = x_ref[...].astype(compute_dtype)
    q_ref[...] = jnp.dot(x, wq_ref[...],
                         preferred_element_type=jnp.float32).astype(q_ref.dtype)
    k_ref[...] = jnp.dot(x, wk_ref[...],
                         preferred_element_type=jnp.float32).astype(k_ref.dtype)
    v_ref[...] = jnp.dot(x, wv_ref[...],
                         preferred_element_type=jnp.float32).astype(v_ref.dtype)


# ----------------------------------------------------------------------------
# Kernel 2: attention for one (batch, query-tile) + fc proj + residual + LN1.
# ----------------------------------------------------------------------------
def _attn_kernel(q_ref, k_ref, v_ref, x_ref, mask_ref, wfc_ref, g1_ref, b1_ref,
                 y_ref, attn_ref, ctx_scratch, *,
                 n_heads, d_k, d_v, compute_dtype):
    q = q_ref[0]                                   # [TQ, H*dk] (compute dtype)
    k = k_ref[0]                                   # [S,  H*dk]
    v = v_ref[0]                                   # [S,  H*dv]
    masked = mask_ref[0] != 0                      # [TQ, S]

    # Fold 1/sqrt(d_k) into q (touches TQ*H*dk elements instead of TQ*S per head)
    qs = q * (1.0 / math.sqrt(d_k))

    for h in range(n_heads):                       # static, small head loop
        qh = qs[:, h * d_k:(h + 1) * d_k]
        kh = k[:, h * d_k:(h + 1) * d_k]
        vh = v[:, h * d_v:(h + 1) * d_v]

        s = jnp.dot(qh, kh.T, preferred_element_type=jnp.float32)   # [TQ, S] f32
        s = jnp.where(masked, -1000000000.0, s)    # matches masked_fill_(-1e9)

        # softmax in f32
        m = jnp.max(s, axis=-1, keepdims=True)
        e = jnp.exp(s - m)
        denom = jnp.sum(e, axis=-1, keepdims=True)
        p = e * pl.reciprocal(denom, approx=False)
        attn_ref[0, h] = p.astype(attn_ref.dtype)

        # per-head context written into aligned VMEM scratch slice (no concat)
        ctx_scratch[:, h * d_v:(h + 1) * d_v] = jnp.dot(
            p.astype(compute_dtype), vh, preferred_element_type=jnp.float32)

    # single full-width output projection + residual + LayerNorm (f32)
    ctx = ctx_scratch[...].astype(compute_dtype)                 # [TQ, H*dv]
    proj = jnp.dot(ctx, wfc_ref[...], preferred_element_type=jnp.float32)
    y_ref[0] = _layernorm(proj + x_ref[0], g1_ref[...], b1_ref[...]
                          ).astype(y_ref.dtype)


# ----------------------------------------------------------------------------
# Kernel 3: position-wise FFN, chunked over d_ff, + residual + LN2.
# ----------------------------------------------------------------------------
def _ffn_kernel(y_ref, w1_ref, w2_ref, g2_ref, b2_ref, out_ref, acc_ref, *,
                compute_dtype):
    f = pl.program_id(1)

    @pl.when(f == 0)
    def _():
        acc_ref[...] = jnp.zeros_like(acc_ref)

    y = y_ref[...]                                              # [TR, D] f32
    h1 = jnp.maximum(
        jnp.dot(y.astype(compute_dtype), w1_ref[...],
                preferred_element_type=jnp.float32), 0.0)       # [TR, TF]
    acc_ref[...] += jnp.dot(h1.astype(compute_dtype), w2_ref[...],
                            preferred_element_type=jnp.float32)  # [TR, D]

    @pl.when(f == pl.num_programs(1) - 1)
    def _():
        out_ref[...] = _layernorm(acc_ref[...] + y, g2_ref[...], b2_ref[...]
                                  ).astype(out_ref.dtype)


# ----------------------------------------------------------------------------
# Wrapper
# ----------------------------------------------------------------------------
def encoder_layer(x, mask, params, *, n_heads, d_k, d_v,
                  q_tile=None, row_tile=None, ff_tile=None,
                  compute_dtype=jnp.float32,
                  vmem_limit_bytes=32 * 1024 * 1024):
    B, S, D = x.shape
    HK = n_heads * d_k
    HV = n_heads * d_v
    d_ff = params["w1"].shape[1]
    rows = B * S

    def _pick(total, requested, preferred):
        t = requested if requested is not None else (
            preferred if total % preferred == 0 else total)
        assert total % t == 0, f"tile {t} must divide {total}"
        return t

    TQ = _pick(S, q_tile, 128)       # query tile (attention)
    TR = _pick(rows, row_tile, 256)  # row tile (QKV proj / FFN)
    TF = _pick(d_ff, ff_tile, 512)   # d_ff chunk (FFN)
    # (8, 128) block legality
    assert TQ == S or TQ % 8 == 0
    assert TR == rows or TR % 8 == 0
    assert TF == d_ff or TF % 128 == 0

    cdt = compute_dtype
    wq = params["wq"].astype(cdt)
    wk = params["wk"].astype(cdt)
    wv = params["wv"].astype(cdt)
    wfc = params["wfc"].astype(cdt)
    w1 = params["w1"].astype(cdt)
    w2 = params["w2"].astype(cdt)
    g1 = params["g1"].astype(jnp.float32)
    b1 = params["b1"].astype(jnp.float32)
    g2 = params["g2"].astype(jnp.float32)
    b2 = params["b2"].astype(jnp.float32)
    mask_i = mask.astype(jnp.int32)

    def _cp(sem):
        return pltpu.CompilerParams(dimension_semantics=sem,
                                    vmem_limit_bytes=vmem_limit_bytes)

    # ---- 1) QKV projections over row tiles -------------------------------
    x2d = x.reshape(rows, D)
    q_all, k_all, v_all = pl.pallas_call(
        functools.partial(_qkv_kernel, compute_dtype=cdt),
        out_shape=(
            jax.ShapeDtypeStruct((rows, HK), cdt),
            jax.ShapeDtypeStruct((rows, HK), cdt),
            jax.ShapeDtypeStruct((rows, HV), cdt),
        ),
        grid_spec=pltpu.PrefetchScalarGridSpec(
            num_scalar_prefetch=0,
            grid=(rows // TR,),
            in_specs=[
                pl.BlockSpec((TR, D), lambda r: (r, 0)),
                pl.BlockSpec((D, HK), lambda r: (0, 0)),
                pl.BlockSpec((D, HK), lambda r: (0, 0)),
                pl.BlockSpec((D, HV), lambda r: (0, 0)),
            ],
            out_specs=[
                pl.BlockSpec((TR, HK), lambda r: (r, 0)),
                pl.BlockSpec((TR, HK), lambda r: (r, 0)),
                pl.BlockSpec((TR, HV), lambda r: (r, 0)),
            ],
        ),
        compiler_params=_cp(("parallel",)),
    )(x2d, wq, wk, wv)

    q3 = q_all.reshape(B, S, HK)
    k3 = k_all.reshape(B, S, HK)
    v3 = v_all.reshape(B, S, HV)

    # ---- 2) attention per (batch, q-tile) + fc + residual + LN1 ----------
    y1, attn = pl.pallas_call(
        functools.partial(_attn_kernel, n_heads=n_heads, d_k=d_k, d_v=d_v,
                          compute_dtype=cdt),
        out_shape=(
            jax.ShapeDtypeStruct((B, S, D), jnp.float32),
            jax.ShapeDtypeStruct((B, n_heads, S, S), jnp.float32),
        ),
        grid_spec=pltpu.PrefetchScalarGridSpec(
            num_scalar_prefetch=0,
            grid=(B, S // TQ),
            in_specs=[
                pl.BlockSpec((1, TQ, HK), lambda b, qt: (b, qt, 0)),   # Q tile
                pl.BlockSpec((1, S, HK), lambda b, qt: (b, 0, 0)),     # K (full)
                pl.BlockSpec((1, S, HV), lambda b, qt: (b, 0, 0)),     # V (full)
                pl.BlockSpec((1, TQ, D), lambda b, qt: (b, qt, 0)),    # residual
                pl.BlockSpec((1, TQ, S), lambda b, qt: (b, qt, 0)),    # mask
                pl.BlockSpec((HV, D), lambda b, qt: (0, 0)),           # fc
                pl.BlockSpec((1, D), lambda b, qt: (0, 0)),            # ln1 gamma
                pl.BlockSpec((1, D), lambda b, qt: (0, 0)),            # ln1 beta
            ],
            out_specs=[
                pl.BlockSpec((1, TQ, D), lambda b, qt: (b, qt, 0)),
                pl.BlockSpec((1, n_heads, TQ, S), lambda b, qt: (b, 0, qt, 0)),
            ],
            scratch_shapes=[pltpu.VMEM((TQ, HV), jnp.float32)],
        ),
        compiler_params=_cp(("parallel", "parallel")),
    )(q3, k3, v3, x, mask_i, wfc, g1, b1)

    # ---- 3) FFN (chunked over d_ff) + residual + LN2 ----------------------
    y2d = y1.reshape(rows, D)
    out2d = pl.pallas_call(
        functools.partial(_ffn_kernel, compute_dtype=cdt),
        out_shape=jax.ShapeDtypeStruct((rows, D), jnp.float32),
        grid_spec=pltpu.PrefetchScalarGridSpec(
            num_scalar_prefetch=0,
            grid=(rows // TR, d_ff // TF),
            in_specs=[
                pl.BlockSpec((TR, D), lambda r, f: (r, 0)),
                pl.BlockSpec((D, TF), lambda r, f: (0, f)),
                pl.BlockSpec((TF, D), lambda r, f: (f, 0)),
                pl.BlockSpec((1, D), lambda r, f: (0, 0)),
                pl.BlockSpec((1, D), lambda r, f: (0, 0)),
            ],
            out_specs=pl.BlockSpec((TR, D), lambda r, f: (r, 0)),
            scratch_shapes=[pltpu.VMEM((TR, D), jnp.float32)],
        ),
        compiler_params=_cp(("parallel", "arbitrary")),
    )(y2d, w1, w2, g2, b2)

    return out2d.reshape(B, S, D), attn


def init_params(key, d_model, d_ff, d_k, d_v, n_heads):
    ks = jax.random.split(key, 6)
    scale = 0.05
    return {
        "wq": scale * jax.random.normal(ks[0], (d_model, n_heads * d_k), jnp.float32),
        "wk": scale * jax.random.normal(ks[1], (d_model, n_heads * d_k), jnp.float32),
        "wv": scale * jax.random.normal(ks[2], (d_model, n_heads * d_v), jnp.float32),
        "wfc": scale * jax.random.normal(ks[3], (n_heads * d_v, d_model), jnp.float32),
        "w1": scale * jax.random.normal(ks[4], (d_model, d_ff), jnp.float32),
        "w2": scale * jax.random.normal(ks[5], (d_ff, d_model), jnp.float32),
        "g1": jnp.ones((1, d_model), jnp.float32),
        "b1": jnp.zeros((1, d_model), jnp.float32),
        "g2": jnp.ones((1, d_model), jnp.float32),
        "b2": jnp.zeros((1, d_model), jnp.float32),
    }


def reference(x, mask, p, *, n_heads, d_k, d_v):
    # pure-JAX replica of the PyTorch EncoderLayer forward
    B, S, D = x.shape

    def ln(v, g, b, eps=1e-5):
        mu = jnp.mean(v, -1, keepdims=True)
        var = jnp.mean((v - mu) ** 2, -1, keepdims=True)
        return (v - mu) * jax.lax.rsqrt(var + eps) * g + b

    q = (x @ p["wq"]).reshape(B, S, n_heads, d_k).transpose(0, 2, 1, 3)
    k = (x @ p["wk"]).reshape(B, S, n_heads, d_k).transpose(0, 2, 1, 3)
    v = (x @ p["wv"]).reshape(B, S, n_heads, d_v).transpose(0, 2, 1, 3)
    s = jnp.einsum("bhqd,bhkd->bhqk", q, k) / jnp.sqrt(jnp.float32(d_k))
    s = jnp.where(mask[:, None, :, :] != 0, -1000000000.0, s)
    attn = jax.nn.softmax(s, axis=-1)
    ctx = jnp.einsum("bhqk,bhkd->bhqd", attn, v)
    ctx = ctx.transpose(0, 2, 1, 3).reshape(B, S, n_heads * d_v)
    y = ln(ctx @ p["wfc"] + x, p["g1"], p["b1"])
    out = ln(jnp.maximum(y @ p["w1"], 0.0) @ p["w2"] + y, p["g2"], p["b2"])
    return out, attn


if __name__ == "__main__":
    B, S = 2, 16
    d_model, d_ff, d_k, d_v, n_heads = 32, 256, 16, 16, 4

    key = jax.random.PRNGKey(0)
    k_x, k_p = jax.random.split(key)
    x = jax.random.normal(k_x, (B, S, d_model), jnp.float32)

    # mask: nonzero == masked position (mask out last 3 key positions)
    mask = jnp.zeros((B, S, S), jnp.int32).at[:, :, S - 3:].set(1)

    params = init_params(k_p, d_model, d_ff, d_k, d_v, n_heads)

    # Small tiles so the demo exercises the multi-step tiled grids
    # (q-tiling, row-tiling, and the chunked-FFN accumulator path).
    out, attn = encoder_layer(x, mask, params, n_heads=n_heads, d_k=d_k, d_v=d_v,
                              q_tile=8, row_tile=8, ff_tile=128)
    jax.block_until_ready((out, attn))

    assert out.shape == (B, S, d_model)
    assert attn.shape == (B, n_heads, S, S)

    ref_out, ref_attn = reference(x, mask, params, n_heads=n_heads, d_k=d_k, d_v=d_v)
    np.testing.assert_allclose(np.asarray(out), np.asarray(ref_out), rtol=2e-2, atol=2e-2)
    np.testing.assert_allclose(np.asarray(attn), np.asarray(ref_attn), rtol=2e-2, atol=2e-2)

    print("KERNEL_OK")
</pallas_src>

<mosaic_0001>
module attributes {stable_mosaic.version = 11 : i64} {
  func.func @_qkv_kernel(%arg0: i32, %arg1: memref<8x32xf32, #tpu.memory_space<vmem>>, %arg2: memref<32x64xf32, #tpu.memory_space<vmem>>, %arg3: memref<32x64xf32, #tpu.memory_space<vmem>>, %arg4: memref<32x64xf32, #tpu.memory_space<vmem>>, %arg5: memref<8x64xf32, #tpu.memory_space<vmem>>, %arg6: memref<8x64xf32, #tpu.memory_space<vmem>>, %arg7: memref<8x64xf32, #tpu.memory_space<vmem>>) attributes {dimension_semantics = [#tpu.dimension_semantics<parallel>], iteration_bounds = array<i64: 4>, scalar_prefetch = 0 : i64, scratch_operands = 0 : i64, tpu.core_type = #tpu.core_type<tc>, window_params = [{transform_indices = @transform_0, window_bounds = array<i64: 8, 32>}, {pipeline_mode = #tpu.pipeline_mode<synchronous>, transform_indices = @transform_1, window_bounds = array<i64: 32, 64>}, {pipeline_mode = #tpu.pipeline_mode<synchronous>, transform_indices = @transform_2, window_bounds = array<i64: 32, 64>}, {pipeline_mode = #tpu.pipeline_mode<synchronous>, transform_indices = @transform_3, window_bounds = array<i64: 32, 64>}, {transform_indices = @transform_4, window_bounds = array<i64: 8, 64>}, {transform_indices = @transform_5, window_bounds = array<i64: 8, 64>}, {transform_indices = @transform_6, window_bounds = array<i64: 8, 64>}]} {
    %c0 = arith.constant 0 : index
    %c0_0 = arith.constant 0 : index
    %0 = vector.load %arg1[%c0, %c0_0] : memref<8x32xf32, #tpu.memory_space<vmem>>, vector<8x32xf32>
    %c0_1 = arith.constant 0 : index
    %c0_2 = arith.constant 0 : index
    %1 = vector.load %arg2[%c0_1, %c0_2] : memref<32x64xf32, #tpu.memory_space<vmem>>, vector<32x64xf32>
    %cst = arith.constant dense<0.000000e+00> : vector<8x64xf32>
    %2 = tpu.matmul %0, %1, %cst {dimension_numbers = #tpu.dot_dimension_numbers<[1], [0], [0], [1], [0, 0, 1, 1], [], []>} : vector<8x32xf32>, vector<32x64xf32>, vector<8x64xf32> -> vector<8x64xf32>
    %c0_3 = arith.constant 0 : index
    %c0_4 = arith.constant 0 : index
    %3 = vector.load %arg5[%c0_3, %c0_4] : memref<8x64xf32, #tpu.memory_space<vmem>>, vector<8x64xf32>
    tpu.vector_store %arg5[%c0_3, %c0_4], %2 {strides = array<i32>} : memref<8x64xf32, #tpu.memory_space<vmem>>, vector<8x64xf32>,
    %c0_5 = arith.constant 0 : index
    %c0_6 = arith.constant 0 : index
    %4 = vector.load %arg3[%c0_5, %c0_6] : memref<32x64xf32, #tpu.memory_space<vmem>>, vector<32x64xf32>
    %cst_7 = arith.constant dense<0.000000e+00> : vector<8x64xf32>
    %5 = tpu.matmul %0, %4, %cst_7 {dimension_numbers = #tpu.dot_dimension_numbers<[1], [0], [0], [1], [0, 0, 1, 1], [], []>} : vector<8x32xf32>, vector<32x64xf32>, vector<8x64xf32> -> vector<8x64xf32>
    %c0_8 = arith.constant 0 : index
    %c0_9 = arith.constant 0 : index
    %6 = vector.load %arg6[%c0_8, %c0_9] : memref<8x64xf32, #tpu.memory_space<vmem>>, vector<8x64xf32>
    tpu.vector_store %arg6[%c0_8, %c0_9], %5 {strides = array<i32>} : memref<8x64xf32, #tpu.memory_space<vmem>>, vector<8x64xf32>,
    %c0_10 = arith.constant 0 : index
    %c0_11 = arith.constant 0 : index
    %7 = vector.load %arg4[%c0_10, %c0_11] : memref<32x64xf32, #tpu.memory_space<vmem>>, vector<32x64xf32>
    %cst_12 = arith.constant dense<0.000000e+00> : vector<8x64xf32>
    %8 = tpu.matmul %0, %7, %cst_12 {dimension_numbers = #tpu.dot_dimension_numbers<[1], [0], [0], [1], [0, 0, 1, 1], [], []>} : vector<8x32xf32>, vector<32x64xf32>, vector<8x64xf32> -> vector<8x64xf32>
    %c0_13 = arith.constant 0 : index
    %c0_14 = arith.constant 0 : index
    %9 = vector.load %arg7[%c0_13, %c0_14] : memref<8x64xf32, #tpu.memory_space<vmem>>, vector<8x64xf32>
    tpu.vector_store %arg7[%c0_13, %c0_14], %8 {strides = array<i32>} : memref<8x64xf32, #tpu.memory_space<vmem>>, vector<8x64xf32>,
    return
  }
  func.func @transform_0(%arg0: i32) -> (i32, i32) {
    %c0_i32 = arith.constant 0 : i32
    %c0_i32_0 = arith.constant 0 : i32
    return %arg0, %c0_i32 : i32, i32
  }
  func.func @transform_1(%arg0: i32) -> (i32, i32) {
    %c0_i32 = arith.constant 0 : i32
    %c0_i32_0 = arith.constant 0 : i32
    %c0_i32_1 = arith.constant 0 : i32
    return %c0_i32, %c0_i32_0 : i32, i32
  }
  func.func @transform_2(%arg0: i32) -> (i32, i32) {
    %c0_i32 = arith.constant 0 : i32
    %c0_i32_0 = arith.constant 0 : i32
    %c0_i32_1 = arith.constant 0 : i32
    return %c0_i32, %c0_i32_0 : i32, i32
  }
  func.func @transform_3(%arg0: i32) -> (i32, i32) {
    %c0_i32 = arith.constant 0 : i32
    %c0_i32_0 = arith.constant 0 : i32
    %c0_i32_1 = arith.constant 0 : i32
    return %c0_i32, %c0_i32_0 : i32, i32
  }
  func.func @transform_4(%arg0: i32) -> (i32, i32) {
    %c0_i32 = arith.constant 0 : i32
    %c0_i32_0 = arith.constant 0 : i32
    return %arg0, %c0_i32 : i32, i32
  }
  func.func @transform_5(%arg0: i32) -> (i32, i32) {
    %c0_i32 = arith.constant 0 : i32
    %c0_i32_0 = arith.constant 0 : i32
    return %arg0, %c0_i32 : i32, i32
  }
  func.func @transform_6(%arg0: i32) -> (i32, i32) {
    %c0_i32 = arith.constant 0 : i32
    %c0_i32_0 = arith.constant 0 : i32
    return %arg0, %c0_i32 : i32, i32
  }
}

</mosaic_0001>

<bundles_post_ra>
// kernel: tpu_custom_call.1
= control target key start
LH: loop header
LB: loop body
LE: loop exit
PB: predicated region body
PF: predicated region fallthrough
CT: control target
= control target key end

     0   :  { %s1492_s0 = inlined_call_operand.hbm [shape: f32[32,32], index: 0, kind: input, shape index: {}]   ;;  %s1493_s1 = inlined_call_operand.hbm [shape: f32[32,64], index: 1, kind: input, shape index: {}]   ;;  %s1494_s2 = inlined_call_operand.hbm [shape: f32[32,64], index: 2, kind: input, shape index: {}]   ;;  %s1495_s3 = inlined_call_operand.hbm [shape: f32[32,64], index: 3, kind: input, shape index: {}]   ;;  %s1496_s4 = inlined_call_operand.hbm [shape: f32[32,64], index: 4, kind: output, shape index: {0}]   ;;  %s1497_s5 = inlined_call_operand.hbm [shape: f32[32,64], index: 5, kind: output, shape index: {1}]   ;;  %s1498_s6 = inlined_call_operand.hbm [shape: f32[32,64], index: 6, kind: output, shape index: {2}]  }
   0x1   :  { %1505 = sst [smem:[#allocation19_spill]] %s1493_s1 }
   0x2   :  { %12 = vsyncpa [#allocation3], 0 }
   0x3   :  { %14 = vsyncpa [#allocation3 + $0x1], 0 }
   0x4   :  { %15 = vsyncpa [#allocation6], 0 }
   0x5   :  { %16 = vsyncpa [#allocation9], 0 }
   0x6   :  { %17 = vsyncpa [#allocation4], 0 }
   0x7   :  { %19 = vsyncpa [#allocation4 + $0x1], 0 }
   0x8   :  { %20 = vsyncpa [#allocation12], 0 }
   0x9   :  { %22 = vsyncpa [#allocation12 + $0x1], 0  ;;  %s1218_s21 = smov 0   ;;  %s1220_s22 = smov 0  }
   0xa   :  { %s1222_s23 = smov 0   ;;  %s1224_s24 = smov 0  }
   0xb LB: > { %s1239_s25 = sadd.s32 4294967295, %s1170_s24   ;;  %s1501_s26 = sadd.s32 4294967294, %s1170_s24   ;;  %s1170_s24 = sphi %s1224_s24, %s1528_s24   ;;  %s1166_s23 = sphi %s1222_s23, %s1527_s23   ;;  %s1162_s22 = sphi %s1220_s22, %s1526_s22   ;;  %s1158_s21 = sphi %s1218_s21, %s1525_s21  }
   0xc   : > { %p48_p0 = scmp.ne.s32.totalorder %s1162_s22, %s1158_s21  ;;  %p1499_p1 = scmp.eq.s32.totalorder %s1239_s25, 0 }
   0xd   : > { %p141_p3 = scmp.eq.s32.totalorder %s1501_s26, 3  ;;  %p771_p5 = scmp.ge.s32.totalorder %s1170_s24, 1 }
   0xe   : > { %p1250_p4 = por %p1499_p1, %p48_p0  ;;  %p200_p7 = scmp.lt.s32.totalorder %s1170_s24, 5 }
   0xf   : > { %p1255_p6 = por %p141_p3, %p48_p0  ;;  %s1172_s30 = smov [#allocation5]  }
  0x10   : > { %s1506_s27 = scalar_select %p1250_p4, 1, 0 }
  0x11   : > { %s1507_s28 = scalar_select %p1255_p6, 1, 0 }
  0x12   : > { %p1260_p8 = pnand %p771_p5, %p200_p7  ;;  %s212_s7 = sshll.u32 %s1172_s30, 4  ;;  %s213_s7 = int_to_ptr.vmem [resolvable:$true] %s212_s7 }
  0x13   : > { %s1173_s9 = smov [#allocation7]   ;;  %s1174_s11 = smov [#allocation8]  }
  0x14   : > { %s1508_s29 = scalar_select %p1260_p8, 1, 0 }
  0x15   : > { %p865_p9 = pneg %p1260_p8  ;;  %s225_s10 = sshll.u32 %s1173_s9, 4  ;;  %s226_s10 = int_to_ptr.vmem [resolvable:$true] %s225_s10 }
  0x16   : > { %s238_s12 = sshll.u32 %s1174_s11, 4  ;;  %s947_s13 = scalar_lea.vmem %s213_s7, 512  ;;  %s239_s12 = int_to_ptr.vmem [resolvable:$true] %s238_s12 }
  0x17   : > { %p1268_p10 = pnand %p865_p9, %p1499_p1  ;;  %p948_p12 = scmp.ne.s32.totalorder %s213_s7, %s947_s13 }
  0x18   : > { %p955_p3 = scmp.lt.s32.totalorder %s213_s7, %s213_s7  ;;  %p956_p5 = scmp.lt.s32.totalorder %s947_s13, %s947_s13 }
  0x19   : > { %p938_p11 = pneg %p1268_p10 }
  0x1a   : > { %p957_p7 = por %p956_p5, %p955_p3 }
  0x1b   : > { %p950_p13 = pnand %p948_p12, %p938_p11 }
  0x1d   : > { %p951_p0 = pneg %p950_p13 }
  0x1f   : > { %p958_p9 = pnand %p957_p7, %p951_p0 }
  0x21   : > { %961 = shalt.err (!%p958_p9)
}
  0x22   : > { %s1175_s14 = smov 128   ;;  %s1176_s15 = smov 8  }
  0x23   : > { %s1510_s1 = sld [smem:[#allocation19_spill]]  ;;  %s973_s18 = scalar_lea.vmem %s226_s10, 512 }
  0x24   : > { %p974_p1 = scmp.ne.s32.totalorder %s226_s10, %s973_s18  ;;  %p981_p2 = scmp.lt.s32.totalorder %s226_s10, %s226_s10 }
  0x25   : > { %p982_p6 = scmp.lt.s32.totalorder %s973_s18, %s973_s18 }
  0x26   : > { %p976_p12 = pnand %p974_p1, %p938_p11 }
  0x27   : > { %p983_p3 = por %p982_p6, %p981_p2 }
  0x28   : > { %p977_p13 = pneg %p976_p12 }
  0x29   : > { %868 = dma.hbm_to_vmem [thread:$0]  (!%p1268_p10), %s1510_s1, 512, %s213_s7, [#allocation6], %s1175_s14, %s1175_s14, %s1176_s15  }
  0x2a   : > { %p984_p0 = pnand %p983_p3, %p977_p13 }
  0x2c   : > { %987 = shalt.err (!%p984_p0)
}
  0x2d   : > { %871 = dma.hbm_to_vmem [thread:$0]  (!%p1268_p10), %s1494_s2, 512, %s226_s10, [#allocation6], %s1175_s14, %s1175_s14, %s1176_s15  }
  0x2e   : > { %s999_s30 = scalar_lea.vmem %s239_s12, 512  ;;  %p1007_p9 = scmp.lt.s32.totalorder %s239_s12, %s239_s12 }
  0x2f   : > { %p1000_p5 = scmp.ne.s32.totalorder %s239_s12, %s999_s30  ;;  %p1008_p12 = scmp.lt.s32.totalorder %s999_s30, %s999_s30 }
  0x31   : > { %p1002_p7 = pnand %p1000_p5, %p938_p11  ;;  %p1009_p4 = por %p1008_p12, %p1007_p9 }
  0x33   : > { %p1003_p1 = pneg %p1002_p7 }
  0x35   : > { %p1010_p2 = pnand %p1009_p4, %p1003_p1 }
  0x37   : > { %1013 = shalt.err (!%p1010_p2)
}
  0x38   : > { %874 = dma.hbm_to_vmem [thread:$0]  (!%p1268_p10), %s1495_s3, 512, %s239_s12, [#allocation9], %s1175_s14, %s1175_s14, %s1176_s15  }
  0x39   : > { %s1299_s10 = sadd.s32 1, %s1170_s24   ;;  %s35_s8 = sadd.s32 1, %s1166_s23 }
  0x3a   : > { %s32_s11 = ssub.s32 %s1170_s24, %s1299_s10  ;;  %p42_p6 = scmp.ne.s32.totalorder %s1166_s23, %s1162_s22 }
  0x3b   : > { %p33_p4 = scmp.eq.s32.totalorder %s32_s11, 0  ;;  %p43_p11 = scmp.eq.s32.totalorder %s1170_s24, 0 }
  0x3c   : > { %p892_p13 = scmp.lt.s32.totalorder %s1170_s24, 4  ;;  %p1511_p0 = scmp.eq.s32.totalorder %s1239_s25, 3 }
  0x3d   : > { %s1309_s13 = scalar_select %p33_p4, %s1166_s23, %s35_s8  }
  0x3e   : > { %p44_p3 = por %p43_p11, %p42_p6  ;;  %p1313_p5 = por %p1511_p0, %p42_p6 }
  0x3f   : > { %s252_s17 = sand.u32 1, %s1166_s23   ;;  %s777_s18 = sshll.u32 %s1170_s24, 7 }
  0x40   : > { %s1512_s16 = scalar_select %p1313_p5, 1, 0 }
  0x41   : > { %s776_s12 = sshll.u32 %s252_s17, 3  ;;  %s1322_s19 = scalar_lea.hbm %s1492_s0, %s777_s18 }
  0x42   : > { %s256_s20 = scalar_lea.vmem [#allocation2], %s776_s12  ;;  %p1324_p10 = pnand %p892_p13, %p44_p3 }
  0x43   : > { %s263_s30 = sshll.u32 %s256_s20, 4  ;;  %s253_s9 = scalar_lea.sflag [#allocation3], %s252_s17  ;;  %s264_s30 = int_to_ptr.vmem [resolvable:$true] %s263_s30 }
  0x44   : > { %s1014_s11 = scalar_lea.hbm %s1322_s19, 128  ;;  %p1016_p1 = pneg %p1324_p10 }
  0x45   : > { %p1015_p7 = scmp.ne.s32.totalorder %s1322_s19, %s1014_s11  ;;  %s1019_s14 = scalar_lea.hbm %s1492_s0, 512 }
  0x46   : > { %p1020_p2 = scmp.lt.s32.totalorder %s1322_s19, %s1492_s0  ;;  %p1021_p4 = scmp.lt.s32.totalorder %s1019_s14, %s1014_s11 }
  0x47   : > { %p1017_p9 = pnand %p1016_p1, %p1015_p7 }
  0x48   : > { %p1022_p6 = por %p1021_p4, %p1020_p2 }
  0x49   : > { %p1018_p12 = pneg %p1017_p9 }
  0x4b   : > { %p1023_p11 = pnand %p1022_p6, %p1018_p12 }
  0x4d   : > { %1026 = shalt.err (!%p1023_p11)
}
  0x4e   : > { %s1027_s20 = scalar_lea.vmem %s264_s30, 128  ;;  %s1177_s17 = smov [#allocation2]  }
  0x4f   : > { %p1028_p13 = scmp.ne.s32.totalorder %s264_s30, %s1027_s20  ;;  %s1032_s26 = sshll.u32 %s1177_s17, 4  ;;  %s1033_s26 = int_to_ptr.vmem [resolvable:$false] %s1032_s26 }
  0x50   : > { %s1034_s1 = scalar_lea.vmem %s1033_s26, 256  ;;  %p1035_p7 = scmp.lt.s32.totalorder %s264_s30, %s1033_s26 }
  0x51   : > { %p1030_p3 = pnand %p1028_p13, %p1016_p1  ;;  %p1036_p9 = scmp.lt.s32.totalorder %s1034_s1, %s1027_s20 }
  0x53   : > { %p1031_p0 = pneg %p1030_p3  ;;  %p1037_p5 = por %p1036_p9, %p1035_p7 }
  0x55   : > { %p1038_p8 = pnand %p1037_p5, %p1031_p0 }
  0x57   : > { %1041 = shalt.err (!%p1038_p8)
}
  0x58   : > { %878 = dma.hbm_to_vmem [thread:$0]  (!%p1324_p10), %s1322_s19, 128, %s264_s30, %s253_s9  }
  0x59   : > { %p1514_p12 = scmp.ne.s32.totalorder %s1508_s29, 0 }
  0x5a   : > { %s1345_s11 = sand.u32 (!%p1514_p12), 1, %s1162_s22   ;;  %p1515_p5 = scmp.ne.s32.totalorder (!%p1514_p12), %s1506_s27, 0 }
  0x5b   : > { %272 = sbr.rel (%p1514_p12) target bundleno = 366 (0x16e), region = 36  ;;  %s1348_s8 = sshll.u32 (!%p1514_p12), %s1345_s11, 3 }
  0x5c   : > { %s275_s1 = scalar_lea.sflag (!%p1514_p12), [#allocation3], %s1345_s11  ;;  %s278_s26 = scalar_lea.vmem (!%p1514_p12), [#allocation2], %s1348_s8 }
  0x60   : > { %1137 = dma.done.wait (%p1515_p5), %s275_s1, 128  }
  0x61   : > { %1139 = vsyncadd (%p1515_p5), %s275_s1, 4294967168  ;;  %p1516_p8 = scmp.eq.s32.totalorder %s1239_s25, 0 }
  0x63   : > { %1141 = dma.done.wait (%p1516_p8), [#allocation6], 1024   ;;  %p1517_p10 = pmov %p1516_p8 }
  0x64   : > { %p1518_p1 = pmov %p1516_p8 }
  0x65   : > { %1143 = vsyncadd (%p1517_p10), [#allocation6], 4294966272 }
  0x66   : > { %1145 = dma.done.wait (%p1518_p1), [#allocation9], 512   ;;  %p1519_p2 = pmov %p1518_p1 }
  0x67   : > { %v1178_v0 = vmov 0.0   ;;  %vm1179_vm0 = vmmov 0   ;;  %v333_v1 = vld [vmem:[#allocation5 + $0x18] sm:$0xff]  ;;  %v332_v2 = vld [vmem:[#allocation5 + $0x10] sm:$0xff]  ;;  %v331_v4 = vld [vmem:[#allocation5 + $0x8] sm:$0xff]  ;;  %vm334_vm1 = vcmask 261120  }
  0x68   : > { %1147 = vsyncadd (%p1519_p2), [#allocation9], 4294966784  ;;  %812 = vmatprep.subr.mxu0 %v1178_v0  ;;  %823 = vmatprep.subr.mxu1 %v1178_v0  ;;  %v413_v3 = vld [vmem:[#allocation7 + $0x18] sm:$0xff]  ;;  %v412_v5 = vld [vmem:[#allocation7 + $0x10] sm:$0xff]  ;;  %s1371_s27 = sshll.u32 %s1239_s25, 7  ;;  %s314_s29 = scalar_lea.vmem [#allocation10], %s1348_s8 }
  0x69   : > { %820 = vmatprep.mubr.msk.f32.mxu0 %vm1179_vm0, %v1178_v0  ;;  %831 = vmatprep.mubr.msk.f32.mxu1 %vm1179_vm0, %v1178_v0  ;;  %v411_v6 = vld [vmem:[#allocation7 + $0x8] sm:$0xff]  ;;  %v330_v7 = vld [vmem:[#allocation5] sm:$0xff]  ;;  %v329_v8 = vld [vmem:[%s278_s26] sm:$0xff]  ;;  %s584_s19 = sshll.u32 %s314_s29, 4  ;;  %vm408_vm2 = vcmask 523264   ;;  %s1504_s7 = scalar_lea.vmem [#allocation11], %s1348_s8  ;;  %s1384_s19 = int_to_ptr.vmem [resolvable:$true] %s584_s19 }
  0x6a   : > { %813 = vmatpush3.msra.mxu0 %v333_v1  ;;  %824 = vmatpush3.msra.mxu1 %v413_v3  ;;  %v488_v9 = vld [vmem:[#allocation8 + $0x18] sm:$0xff]  ;;  %v410_v10 = vld [vmem:[#allocation7] sm:$0xff]  ;;  %v487_v11 = vld [vmem:[#allocation8 + $0x10] sm:$0xff]  ;;  %s597_s9 = sshll.u32 %s1504_s7, 4  ;;  %s1382_s15 = scalar_lea.hbm %s1496_s4, %s1371_s27  ;;  %s1393_s9 = int_to_ptr.vmem [resolvable:$true] %s597_s9 }
  0x6b   : > { %814 = vmatprep.subr.mxu0 %v1178_v0  ;;  %825 = vmatprep.subr.mxu1 %v1178_v0  ;;  %v486_v12 = vld [vmem:[#allocation8 + $0x8] sm:$0xff]  ;;  %v485_v13 = vld [vmem:[#allocation8] sm:$0xff]  ;;  %s1391_s17 = scalar_lea.hbm %s1497_s5, %s1371_s27  ;;  %s561_s1 = scalar_lea.sflag [#allocation4], %s1345_s11 }
  0x6c   : > { %815 = vmatpush3.msra.mxu0 %v332_v2  ;;  %826 = vmatpush3.msra.mxu1 %v412_v5  ;;  %s1042_s26 = scalar_lea.vmem %s1384_s19, 128  ;;  %p1520_p6 = scmp.ne.s32.totalorder %s1512_s16, 0 }
  0x6d   : > { %816 = vmatprep.subr.mxu0 %v1178_v0  ;;  %827 = vmatprep.subr.mxu1 %v1178_v0  ;;  %p1043_p4 = scmp.ne.s32.totalorder %s1384_s19, %s1042_s26  ;;  %s1180_s18 = smov [#allocation10]  }
  0x6e   : > { %817 = vmatpush3.msra.mxu0 %v331_v4  ;;  %828 = vmatpush3.msra.mxu1 %v411_v6  ;;  %s1046_s14 = sshll.u32 %s1180_s18, 4  ;;  %s1047_s14 = int_to_ptr.vmem [resolvable:$false] %s1046_s14 }
  0x6f   : > { %818 = vmatprep.subr.mxu0 %v1178_v0  ;;  %829 = vmatprep.subr.mxu1 %v1178_v0  ;;  %p1044_p11 = pnand %p1043_p4, %p1520_p6  ;;  %s1048_s30 = scalar_lea.vmem %s1047_s14, 256 }
  0x70   : > { %819 = vmatpush3.msra.mxu0 %v330_v7  ;;  %830 = vmatpush3.msra.mxu1 %v410_v10  ;;  %p1049_p3 = scmp.lt.s32.totalorder %s1384_s19, %s1047_s14  ;;  %p1050_p0 = scmp.lt.s32.totalorder %s1048_s30, %s1042_s26 }
  0x71   : > { %821 = vmatmul.mubr.msk.f32.vlgmr.msra.gmra.mxu0 %vm334_vm1, %v329_v8  ;;  %834 = vmatprep.subr.mxu0 %v1178_v0  ;;  %p1045_p13 = pneg %p1044_p11 }
  0x72   : > { %835 = vmatpush3.msra.mxu0 %v488_v9  ;;  %832 = vmatmul.mubr.msk.f32.vlgmr.msra.gmra.mxu1 %vm334_vm1, %v329_v8  ;;  %p1051_p7 = por %p1050_p0, %p1049_p3 }
  0x73   : > { %836 = vmatprep.subr.mxu0 %v1178_v0  ;;  %842 = vmatprep.mubr.msk.f32.mxu0 %vm1179_vm0, %v1178_v0 }
  0x74   : > { %837 = vmatpush3.msra.mxu0 %v487_v11  ;;  %p1052_p9 = pnand %p1051_p7, %p1045_p13 }
  0x75   : > { %838 = vmatprep.subr.mxu0 %v1178_v0 }
  0x76   : > { %839 = vmatpush3.msra.mxu0 %v486_v12 }
  0x77   : > { %840 = vmatprep.subr.mxu0 %v1178_v0 }
  0x78   : > { %841 = vmatpush3.msra.mxu0 %v485_v13 }
  0x79   : > { %843 = vmatmul.mubr.msk.f32.vlgmr.msra.gmra.mxu0 %vm334_vm1, %v329_v8 }
 0x131   : > { %v404_v14 = vpop.f32.mrf.mxu0 }
 0x132   : > { %409 = vst.msk [vmem:[%s314_s29] sm:$0xff] %vm408_vm2, %v404_v14  ;;  %v480_v16 = vpop.f32.mrf.mxu1 }
 0x133   : > { %v822_v15 = vpop.f32.mrf.mxu0 }
 0x134   : > { %1055 = shalt.err (!%p1052_p9)
}
 0x135   : > { %s1056_s29 = scalar_lea.hbm %s1382_s15, 128  ;;  %s1060_s20 = scalar_lea.hbm %s1496_s4, 512 }
 0x136   : > { %p1057_p12 = scmp.ne.s32.totalorder %s1382_s15, %s1056_s29  ;;  %p1061_p10 = scmp.lt.s32.totalorder %s1382_s15, %s1496_s4 }
 0x137   : > { %p1062_p1 = scmp.lt.s32.totalorder %s1060_s20, %s1056_s29 }
 0x138   : > { %p1058_p5 = pnand %p1057_p12, %p1520_p6 }
 0x139   : > { %p1063_p2 = por %p1062_p1, %p1061_p10 }
 0x13a   : > { %p1059_p8 = pneg %p1058_p5 }
 0x13c   : > { %p1064_p4 = pnand %p1063_p2, %p1059_p8 }
 0x13e   : > { %1067 = shalt.err (!%p1064_p4)
}
 0x13f   : > { %859 = dma.vmem_to_hbm [thread:$0]  (%p1520_p6), %s1384_s19, 128, %s1382_s15, %s561_s1   ;;  %v833_v17 = vpop.f32.mrf.mxu1 }
 0x140   : > { %s1521_s30 = scalar_lea.vmem [#allocation11], %s1348_s8  ;;  %s328_s7 = scalar_lea.vmem [#allocation13], %s1348_s8 }
 0x141   : > { %484 = vst.msk [vmem:[%s1521_s30] sm:$0xff] %vm408_vm2, %v480_v16  ;;  %s610_s26 = sshll.u32 %s328_s7, 4  ;;  %s1522_s14 = sand.u32 1, %s1239_s25   ;;  %s611_s26 = int_to_ptr.vmem [resolvable:$true] %s610_s26 }
 0x142   : > { %s1424_s29 = scalar_lea.sflag [#allocation12], %s1522_s14  ;;  %s1068_s11 = scalar_lea.vmem %s1393_s9, 128 }
 0x143   : > { %p1069_p11 = scmp.ne.s32.totalorder %s1393_s9, %s1068_s11  ;;  %s1181_s12 = smov [#allocation11]  }
 0x144   : > { %s1072_s20 = sshll.u32 %s1181_s12, 4  ;;  %s1073_s20 = int_to_ptr.vmem [resolvable:$false] %s1072_s20 }
 0x145   : > { %p1070_p13 = pnand %p1069_p11, %p1520_p6  ;;  %s1074_s18 = scalar_lea.vmem %s1073_s20, 256 }
 0x146   : > { %p1075_p0 = scmp.lt.s32.totalorder %s1393_s9, %s1073_s20  ;;  %p1076_p7 = scmp.lt.s32.totalorder %s1074_s18, %s1068_s11 }
 0x147   : > { %p1071_p3 = pneg %p1070_p13 }
 0x148   : > { %p1077_p9 = por %p1076_p7, %p1075_p0 }
 0x14a   : > { %p1078_p12 = pnand %p1077_p9, %p1071_p3 }
 0x14c   : > { %1081 = shalt.err (!%p1078_p12)
}
 0x14d   : > { %s1082_s25 = scalar_lea.hbm %s1391_s17, 128  ;;  %s1086_s1 = scalar_lea.hbm %s1497_s5, 512 }
 0x14e   : > { %p1083_p5 = scmp.ne.s32.totalorder %s1391_s17, %s1082_s25  ;;  %p1087_p1 = scmp.lt.s32.totalorder %s1391_s17, %s1497_s5 }
 0x14f   : > { %p1088_p2 = scmp.lt.s32.totalorder %s1086_s1, %s1082_s25 }
 0x150   : > { %p1084_p8 = pnand %p1083_p5, %p1520_p6 }
 0x151   : > { %p1089_p4 = por %p1088_p2, %p1087_p1 }
 0x152   : > { %p1085_p10 = pneg %p1084_p8 }
 0x154   : > { %p1090_p11 = pnand %p1089_p4, %p1085_p10 }
 0x156   : > { %1093 = shalt.err (!%p1090_p11)
}
 0x157   : > { %860 = dma.vmem_to_hbm [thread:$0]  (%p1520_p6), %s1393_s9, 128, %s1391_s17, %s1424_s29   ;;  %v555_v18 = vpop.f32.mrf.mxu0 }
 0x158   : > { %s1451_s20 = scalar_lea.hbm %s1498_s6, %s1371_s27  ;;  %559 = vst.msk [vmem:[%s328_s7] sm:$0xff] %vm408_vm2, %v555_v18  ;;  %s1094_s18 = scalar_lea.vmem %s611_s26, 128 }
 0x159   : > { %v844_v19 = vpop.f32.mrf.mxu0  ;;  %p1095_p13 = scmp.ne.s32.totalorder %s611_s26, %s1094_s18  ;;  %s1182_s25 = smov [#allocation13]  }
 0x15a   : > { %s1098_s19 = sshll.u32 %s1182_s25, 4  ;;  %s1099_s19 = int_to_ptr.vmem [resolvable:$false] %s1098_s19 }
 0x15b   : > { %p1096_p3 = pnand %p1095_p13, %p1520_p6  ;;  %s1100_s9 = scalar_lea.vmem %s1099_s19, 256 }
 0x15c   : > { %p1101_p7 = scmp.lt.s32.totalorder %s611_s26, %s1099_s19  ;;  %p1102_p9 = scmp.lt.s32.totalorder %s1100_s9, %s1094_s18 }
 0x15d   : > { %p1097_p0 = pneg %p1096_p3 }
 0x15e   : > { %p1103_p12 = por %p1102_p9, %p1101_p7 }
 0x160   : > { %p1104_p5 = pnand %p1103_p12, %p1097_p0 }
 0x162   : > { %1107 = shalt.err (!%p1104_p5)
}
 0x163   : > { %s1108_s8 = scalar_lea.hbm %s1451_s20, 128  ;;  %s1112_s7 = scalar_lea.hbm %s1498_s6, 512 }
 0x164   : > { %p1109_p8 = scmp.ne.s32.totalorder %s1451_s20, %s1108_s8  ;;  %p1113_p2 = scmp.lt.s32.totalorder %s1451_s20, %s1498_s6 }
 0x165   : > { %p1114_p4 = scmp.lt.s32.totalorder %s1112_s7, %s1108_s8 }
 0x166   : > { %p1110_p10 = pnand %p1109_p8, %p1520_p6 }
 0x167   : > { %p1115_p11 = por %p1114_p4, %p1113_p2 }
 0x168   : > { %p1111_p1 = pneg %p1110_p10 }
 0x16a   : > { %p1116_p13 = pnand %p1115_p11, %p1111_p1 }
 0x16c   : > { %1119 = shalt.err (!%p1116_p13)
}
 0x16d   : > { %861 = dma.vmem_to_hbm [thread:$0]  (%p1520_p6), %s611_s26, 128, %s1451_s20, %s1424_s29  }
 0x16e PF: > { %p896_p3 = scmp.ge.s32.totalorder %s1170_s24, 2  ;;  %s622_s30 = sand.u32 1, %s1158_s21  }
 0x16f   : > { %p1523_p0 = scmp.ne.s32.totalorder %s1507_s28, 0  ;;  %s623_s14 = scalar_lea.sflag [#allocation4], %s622_s30 }
 0x171   : > { %p880_p7 = pnand %p896_p3, %p1523_p0 }
 0x173   : > { %p881_p9 = pneg %p880_p7 }
 0x175   : > { %1149 = dma.done.wait (%p881_p9), %s623_s14, 128  }
 0x176   : > { %1151 = vsyncadd (%p881_p9), %s623_s14, 4294967168  ;;  %s1524_s11 = sadd.s32 4294967294, %s1170_s24  }
 0x177   : > { %s631_s12 = sand.u32 1, %s1524_s11  }
 0x178   : > { %s632_s18 = scalar_lea.sflag [#allocation12], %s631_s12 }
 0x179   : > { %1153 = dma.done.wait (%p881_p9), %s632_s18, 256  }
 0x17a   : > { %1155 = vsyncadd (%p881_p9), %s632_s18, 4294967040  ;;  %p25_p6 = scmp.ge.s32.totalorder %s1299_s10, 6   ;;  %s1525_s21 = smov %s1162_s22 }
 0x17b   : > { %s1526_s22 = smov %s1166_s23  ;;  %s1527_s23 = smov %s1309_s13 }
 0x17c   : > { %s1528_s24 = smov %s1299_s10  ;;  %27 = sbr.rel (!%p25_p6) target bundleno = 11 (0xb), region = 125 }
 0x181   :  { %646 = vsyncpa [#allocation3], 1 }
 0x182   :  { %648 = vsyncpa [#allocation3 + $0x1], 1 }
 0x183   :  { %649 = vsyncpa [#allocation6], 1 }
 0x184   :  { %650 = vsyncpa [#allocation9], 1 }
 0x185   :  { %651 = vsyncpa [#allocation4], 1 }
 0x186   :  { %653 = vsyncpa [#allocation4 + $0x1], 1 }
 0x187   :  { %654 = vsyncpa [#allocation12], 1 }
 0x188   :  { %656 = vsyncpa [#allocation12 + $0x1], 1 }

</bundles_post_ra>
